<compile_context>
chip_gen: v7x
topology: tpu7x:2x2x1
jax: 0.10.0
libtpu: 0.0.40
codegen_flags: <defaults>
</compile_context>

<pallas_src>
import numpy as np
import jax
import jax.numpy as jnp
from jax.experimental import pallas as pl
from jax.experimental.pallas import tpu as pltpu


# ----------------------------- configuration -------------------------------

class Args:
    dataset = "cifar10"
    celltype = "forward"
    timestep = 3
    second_avgpooling = 2
    tau = 2.0
    threshold_middle = 1.0
    threshold_low = 1.0


IN_CH = 3
IMG = 16            # scaled-down img_size (cifar10 uses 32)
C1 = 32             # stand-in for first_out_channel = 128
C2 = 64             # stand-in for 256
INTER_CH = 128      # stand-in for classifier_inter_ch = 1024
NUM_FINAL = 100
NUM_CLUSTER = 10
NUM_OUT = NUM_FINAL // NUM_CLUSTER
BN_EPS = 1e-5

BPACK = 4                     # images packed into the lane axis per grid tile
BATCH = 2 * BPACK             # 2 grid tiles -> both TensorCores busy on v7x

P1 = IMG * IMG                                    # positions at full res
H2 = IMG // 2
P2 = H2 * H2                                      # positions after 2x2 avgpool
HF = H2 // Args.second_avgpooling
PF = HF * HF                                      # positions into classifier

# connectivity matrix for both cells (NAS-Bench-201 style, upper triangular)
CON_MAT = ((0, 3, 1, 0),
           (0, 0, 2, 4),
           (0, 0, 0, 3),
           (0, 0, 0, 0))
EDGES = [(r, c) for c in range(1, 4) for r in range(c)]
OPS = tuple(CON_MAT[r][c] for (r, c) in EDGES)
N_LIF = max(1, sum(1 for op in OPS if op in (2, 3)))   # LIF nodes per cell

_EYE = np.eye(BPACK, dtype=np.float32)


# ----------------------- structural (constant) arrays -----------------------

def _tap_masks(h, w):
    """(9, h*w, 1) 0/1 masks: tap k = ky*3+kx is valid at output pixel (y, x)
    iff input pixel (y+ky-1, x+kx-1) is inside the image (zero padding)."""
    ys = np.repeat(np.arange(h), w)
    xs = np.tile(np.arange(w), h)
    m = np.zeros((9, h * w, 1), np.float32)
    for ky in range(3):
        for kx in range(3):
            ok = ((ys + ky - 1 >= 0) & (ys + ky - 1 < h) &
                  (xs + kx - 1 >= 0) & (xs + kx - 1 < w))
            m[ky * 3 + kx, :, 0] = ok.astype(np.float32)
    return jnp.asarray(m)


def _pool_sum_mat(h, w, k):
    """0/1 (ho*wo, h*w) sum matrix for AvgPool2d(k,k); the 1/k^2 scale is
    applied in f32 inside the kernel."""
    ho, wo = h // k, w // k
    m = np.zeros((ho * wo, h * w), np.float32)
    for y in range(h):
        for x in range(w):
            m[(y // k) * wo + (x // k), y * w + x] = 1.0
    return jnp.asarray(m, jnp.bfloat16)


def _cls_pool_mask():
    """(P2, PF*BPACK*C2) mask folding resdownsample2 + torch-order flatten:
    mask[p, pf*D + l] = 1 iff position p pools into cell pf (any lane l)."""
    d = BPACK * C2
    k = Args.second_avgpooling
    m = np.zeros((P2, PF * d), np.float32)
    for p in range(P2):
        y, x = p // H2, p % H2
        pf = (y // k) * HF + (x // k)
        m[p, pf * d:(pf + 1) * d] = 1.0
    return jnp.asarray(m)


def _shift_amounts(w, p, jnp_like):
    """Roll amounts so tap k delivers result[pos] = x[pos + (ky-1)*w + (kx-1)]."""
    out = []
    for ky in range(3):
        for kx in range(3):
            off = (ky - 1) * w + (kx - 1)
            s = (-off) % p if jnp_like else off % p
            out.append(int(s))
    return tuple(out)


def _roll_is_jnp_like():
    """Probe pltpu.roll's shift convention once (tiny kernel, outside jit)."""
    def k(x_ref, o_ref):
        o_ref[...] = pltpu.roll(x_ref[...], shift=1, axis=0)
    x = jnp.tile(jnp.arange(8, dtype=jnp.float32)[:, None], (1, 128))
    y = pl.pallas_call(k, out_shape=jax.ShapeDtypeStruct((8, 128), jnp.float32))(x)
    return bool(np.asarray(y)[1, 0] == 0.0)   # jnp.roll semantics: y[i] = x[i-1]


# ------------------------------ parameters ----------------------------------

def _kaiming_conv(key, kh, kw, cin, cout):
    # nn.init.kaiming_uniform_(w, a=2): bound = sqrt(6 / ((1 + a^2) * fan_in))
    fan_in = kh * kw * cin
    bound = (6.0 / (5.0 * fan_in)) ** 0.5
    w = jax.random.uniform(key, (kh, kw, cin, cout), jnp.float32, -bound, bound)
    return np.asarray(w).reshape(kh * kw, cin, cout)


def _pack_conv9(w9, fuse_k=True):
    """(9, cin, cout) -> block-diag over the packed batch; optionally fuse the
    tap axis into K so the conv is a single (P, 9*BPACK*cin)@(...,BPACK*cout)."""
    cin, cout = w9.shape[1], w9.shape[2]
    wp = np.einsum("kio,ab->kaibo", w9, _EYE).reshape(9, BPACK * cin, BPACK * cout)
    if fuse_k:
        wp = wp.reshape(9 * BPACK * cin, BPACK * cout)
    return jnp.asarray(wp, jnp.bfloat16)


def _pack_mat(w, dtype=jnp.bfloat16):
    """(cin, cout) -> block-diagonal (BPACK*cin, BPACK*cout)."""
    cin, cout = w.shape
    wp = np.einsum("io,ab->aibo", w, _EYE).reshape(BPACK * cin, BPACK * cout)
    return jnp.asarray(wp, dtype)


def _bn_fold(ch):
    # eval-mode BN: gamma=1, beta=0, mean=0, var=1 -> scale=1/sqrt(1+eps), bias=0
    scale = np.full((1, BPACK * ch), 1.0 / np.sqrt(1.0 + BN_EPS), np.float32)
    bias = np.zeros((1, BPACK * ch), np.float32)
    return jnp.asarray(scale), jnp.asarray(bias)


def _init_cell(key, ch):
    w3, w1, sc, bi = [], [], [], []
    for op in OPS:
        if op == 3:
            key, k = jax.random.split(key)
            w3.append(_pack_conv9(_kaiming_conv(k, 3, 3, ch, ch)))
        elif op == 2:
            key, k = jax.random.split(key)
            w1.append(_pack_mat(_kaiming_conv(k, 1, 1, ch, ch)[0]))
        if op in (2, 3):
            s, b = _bn_fold(ch)
            sc.append(s)
            bi.append(b)
    if not w3:
        w3.append(jnp.zeros((9 * BPACK * ch, BPACK * ch), jnp.bfloat16))
    if not w1:
        w1.append(jnp.zeros((BPACK * ch, BPACK * ch), jnp.bfloat16))
    if not sc:
        s, b = _bn_fold(ch)
        sc.append(s)
        bi.append(b)
    return key, {"w3": jnp.stack(w3), "w1": jnp.stack(w1),
                 "s": jnp.stack(sc), "b": jnp.stack(bi)}


def init_params(key):
    p = {}
    p["m1"] = _tap_masks(IMG, IMG)
    p["m2"] = _tap_masks(H2, H2)
    p["p1"] = _pool_sum_mat(IMG, IMG, 2)            # resdownsample1 (sum; *1/4)
    p["cmask"] = _cls_pool_mask()                   # resdownsample2 + flatten
    # stem: conv3x3 (3->C1) + BN (per-tap weights; runs once per tile)
    key, k = jax.random.split(key)
    p["stem_w"] = _pack_conv9(_kaiming_conv(k, 3, 3, IN_CH, C1), fuse_k=False)
    p["stem_s"], p["stem_b"] = _bn_fold(C1)
    # cells
    key, p["cell1"] = _init_cell(key, C1)
    key, p["cell2"] = _init_cell(key, C2)
    # downconv1: BN(C1) -> conv3x3 C1->C2 -> BN(C2)
    key, k = jax.random.split(key)
    p["d_pre_s"], p["d_pre_b"] = _bn_fold(C1)
    p["d_w"] = _pack_conv9(_kaiming_conv(k, 3, 3, C1, C2))
    p["d_post_s"], p["d_post_b"] = _bn_fold(C2)
    # last_act BN
    p["last_s"], p["last_b"] = _bn_fold(C2)
    # classifier fc1: rows in torch flatten order (C, H, W), block-diag packed
    feat = C2 * PF
    key, k1, k2 = jax.random.split(key, 3)
    fc1_w = np.asarray(0.01 * jax.random.normal(k1, (feat, INTER_CH), jnp.float32))
    fc1_pcj = fc1_w.reshape(C2, PF, INTER_CH).transpose(1, 0, 2)      # (PF, C2, J)
    fc1_packed = np.einsum("pcj,ab->pacbj", fc1_pcj, _EYE)
    p["fc1"] = jnp.asarray(
        fc1_packed.reshape(PF * BPACK * C2, BPACK * INTER_CH), jnp.bfloat16)
    # fc2 (zero bias) folded with the boost AvgPool1d matrix, block-diag packed
    fc2_w = np.asarray(0.01 * jax.random.normal(k2, (INTER_CH, NUM_FINAL), jnp.float32))
    rows = np.arange(NUM_FINAL)[:, None] // NUM_CLUSTER
    cols = np.arange(NUM_OUT)[None, :]
    boost = (rows == cols).astype(np.float32) / float(NUM_CLUSTER)
    p["w2b"] = _pack_mat(fc2_w @ boost)                       # (BPACK*INTER, BPACK*10)
    p["b2b"] = jnp.zeros((1, BPACK * NUM_OUT), jnp.float32)
    return p


# ------------------------------ fused kernel --------------------------------

def _make_fused_kernel(args, shifts1, shifts2):
    tau_inv = 1.0 / args.tau
    thr_low = args.threshold_low
    thr_mid = args.threshold_middle
    T = int(args.timestep)
    inv_t = 1.0 / float(T)
    pool1_scale = 1.0 / 4.0
    pool2_scale = 1.0 / float(args.second_avgpooling ** 2)

    def lif(x, v_ref, idx, thr):
        # charge v += (x - v)/tau ; fire v>=thr (ATan fwd = heaviside) ; hard reset
        v = v_ref[...] if idx is None else v_ref[idx]
        v = v + (x - v) * tau_inv
        spike = (v >= thr).astype(jnp.float32)
        v_new = v * (1.0 - spike)
        if idx is None:
            v_ref[...] = v_new
        else:
            v_ref[idx] = v_new
        return spike

    def shifted_taps_bf16(x, m_ref, shifts):
        # 9 zero-padded 3x3-neighbourhood shifts of the flattened-position axis:
        # XLU roll + f32 border mask, then cast to bf16.  No MXU work.
        taps = []
        for k in range(9):
            s = shifts[k]
            if s == 0:                                  # centre tap, mask == 1
                taps.append(x.astype(jnp.bfloat16))
            else:
                r = pltpu.roll(x, shift=s, axis=0)
                taps.append((r * m_ref[k]).astype(jnp.bfloat16))
        return taps

    def conv3x3(x, m_ref, w, shifts):
        # 3x3 'same' conv as ONE big-K bf16 matmul (K = 9*BPACK*Cin).
        xt = jnp.concatenate(shifted_taps_bf16(x, m_ref, shifts), axis=-1)
        return jnp.dot(xt, w, preferred_element_type=jnp.float32)

    def pool3x3(x, m_ref, shifts):
        # AvgPool2d(3, stride 1, pad 1, count_include_pad): rolls + masks only.
        acc = None
        for k in range(9):
            s = shifts[k]
            if s == 0:
                t = x
            else:
                t = pltpu.roll(x, shift=s, axis=0) * m_ref[k]
            acc = t if acc is None else acc + t
        return acc * (1.0 / 9.0)

    def cell(x_in, m_ref, shifts, w3_ref, w1_ref, bns_ref, bnb_ref, v_ref, thr):
        # Neuronal_Cell ('forward'): 0=zero 1=skip 2=1x1conv+BN+LIF
        # 3=3x3conv+BN+LIF 4=avgpool3x3
        cnt = {"w3": 0, "w1": 0, "lif": 0}

        def edge(i, inp):
            op = OPS[i]
            if op == 0:
                return None
            if op == 1:
                return inp
            if op == 4:
                return pool3x3(inp, m_ref, shifts)
            if op == 3:
                j = cnt["w3"]; cnt["w3"] += 1
                y = conv3x3(inp, m_ref, w3_ref[j], shifts)
            else:                                      # op == 2: 1x1 conv
                j = cnt["w1"]; cnt["w1"] += 1
                y = jnp.dot(inp.astype(jnp.bfloat16), w1_ref[j],
                            preferred_element_type=jnp.float32)
            c = cnt["lif"]; cnt["lif"] += 1
            y = y * bns_ref[c] + bnb_ref[c]            # folded BatchNorm (eval)
            return lif(y, v_ref, c, thr)

        def nsum(parts, like):
            parts = [q for q in parts if q is not None]
            if not parts:
                return jnp.zeros_like(like)
            out = parts[0]
            for q in parts[1:]:
                out = out + q
            return out

        x1 = nsum([edge(0, x_in)], x_in)
        x2 = nsum([edge(1, x_in), edge(2, x1)], x_in)
        x3 = nsum([edge(3, x_in), edge(4, x1), edge(5, x2)], x_in)
        return x3

    def kernel(x_ref, m1_ref, m2_ref, p1_ref, cmask_ref,
               stw_ref, sts_ref, stb_ref,
               c1w3_ref, c1w1_ref, c1s_ref, c1b_ref,
               dps_ref, dpb_ref, dw_ref, dqs_ref, dqb_ref,
               c2w3_ref, c2w1_ref, c2s_ref, c2b_ref,
               lns_ref, lnb_ref,
               fc1_ref, w2b_ref, b2b_ref,
               out_ref,
               static_ref, v1_ref, v2_ref, vlast_ref, vcls_ref):
        # ---- stem conv3x3 + BN: timestep-invariant, computed once per tile ----
        xin = x_ref[0]                                    # (P1, BPACK*IN_CH)
        taps = shifted_taps_bf16(xin, m1_ref, shifts1)
        y = None
        for k in range(9):
            z = jnp.dot(taps[k], stw_ref[k], preferred_element_type=jnp.float32)
            y = z if y is None else y + z
        static_ref[...] = y * sts_ref[...] + stb_ref[...]

        # ---- neuron_init(): zero every LIF membrane potential ----
        v1_ref[...] = jnp.zeros_like(v1_ref)
        v2_ref[...] = jnp.zeros_like(v2_ref)
        vlast_ref[...] = jnp.zeros_like(vlast_ref)
        vcls_ref[...] = jnp.zeros_like(vcls_ref)

        acc = jnp.zeros((1, BPACK * NUM_OUT), jnp.float32)
        for _ in range(T):                                # in-kernel timestep loop
            sx = static_ref[...]                          # (P1, BPACK*C1)
            # ---- cell1 (full resolution) ----
            xc = cell(sx, m1_ref, shifts1, c1w3_ref, c1w1_ref, c1s_ref,
                      c1b_ref, v1_ref, thr_low)
            # ---- downconv1: BN -> conv3x3 C1->C2 -> BN ; resdownsample1 ----
            xd = xc * dps_ref[...] + dpb_ref[...]
            xd = conv3x3(xd, m1_ref, dw_ref[...], shifts1)
            xd = xd * dqs_ref[...] + dqb_ref[...]
            xd = jnp.dot(p1_ref[...], xd.astype(jnp.bfloat16),
                         preferred_element_type=jnp.float32) * pool1_scale
            # ---- cell2 (half resolution) ----
            xc2 = cell(xd, m2_ref, shifts2, c2w3_ref, c2w1_ref, c2s_ref,
                       c2b_ref, v2_ref, thr_low)
            # ---- last_act: BN + LIF ----
            sp = lif(xc2 * lns_ref[...] + lnb_ref[...], vlast_ref, None, thr_mid)
            # ---- resdownsample2 + torch flatten, folded into replicate*mask+sum
            sp_rep = jnp.concatenate([sp] * PF, axis=1)          # (P2, PF*D)
            xflat = jnp.sum(sp_rep * cmask_ref[...], axis=0,
                            keepdims=True) * pool2_scale         # (1, PF*D)
            # ---- classifier: Dropout(identity) -> Linear -> LIF -> Linear+bias
            # TODO(synk): Dropout(0.5) implemented as identity (inference mode).
            h = jnp.dot(xflat.astype(jnp.bfloat16), fc1_ref[...],
                        preferred_element_type=jnp.float32)      # (1, BPACK*INTER)
            hs = lif(h, vcls_ref, None, thr_mid)
            boosted = jnp.dot(hs.astype(jnp.bfloat16), w2b_ref[...],
                              preferred_element_type=jnp.float32) + b2b_ref[...]
            acc = acc + boosted

        out_ref[0] = acc * inv_t

    return kernel


# ------------------------------ model forward -------------------------------

def snasnet_forward(params, x_nchw, shifts1, shifts2, args=Args):
    B = x_nchw.shape[0]
    assert B % BPACK == 0, "batch must be a multiple of BPACK"
    nt = B // BPACK
    # NCHW -> (positions, channels); pack BPACK images into the lane axis.
    x = jnp.transpose(x_nchw, (0, 2, 3, 1)).astype(jnp.float32).reshape(B, P1, IN_CH)
    x = x.reshape(nt, BPACK, P1, IN_CH).transpose(0, 2, 1, 3)
    x = x.reshape(nt, P1, BPACK * IN_CH)

    c1, c2 = params["cell1"], params["cell2"]
    consts = [
        params["m1"], params["m2"], params["p1"], params["cmask"],
        params["stem_w"], params["stem_s"], params["stem_b"],
        c1["w3"], c1["w1"], c1["s"], c1["b"],
        params["d_pre_s"], params["d_pre_b"], params["d_w"],
        params["d_post_s"], params["d_post_b"],
        c2["w3"], c2["w1"], c2["s"], c2["b"],
        params["last_s"], params["last_b"],
        params["fc1"], params["w2b"], params["b2b"],
    ]

    def const_spec(a):
        return pl.BlockSpec(a.shape, lambda i, _n=a.ndim: (0,) * _n)

    kernel = _make_fused_kernel(args, shifts1, shifts2)

    out = pl.pallas_call(
        kernel,
        out_shape=jax.ShapeDtypeStruct((nt, 1, BPACK * NUM_OUT), jnp.float32),
        grid=(nt,),
        in_specs=[pl.BlockSpec((1, P1, BPACK * IN_CH), lambda i: (i, 0, 0))] +
                 [const_spec(a) for a in consts],
        out_specs=pl.BlockSpec((1, 1, BPACK * NUM_OUT), lambda i: (i, 0, 0)),
        scratch_shapes=[
            pltpu.VMEM((P1, BPACK * C1), jnp.float32),           # stem features
            pltpu.VMEM((N_LIF, P1, BPACK * C1), jnp.float32),    # cell1 membranes
            pltpu.VMEM((N_LIF, P2, BPACK * C2), jnp.float32),    # cell2 membranes
            pltpu.VMEM((P2, BPACK * C2), jnp.float32),           # last_act membrane
            pltpu.VMEM((1, BPACK * INTER_CH), jnp.float32),      # classifier membrane
        ],
        compiler_params=pltpu.CompilerParams(
            dimension_semantics=("parallel",),
            vmem_limit_bytes=48 * 1024 * 1024),
    )(x, *consts)
    # unpack the lane-packed batch back to (B, NUM_OUT)
    return out.reshape(nt, BPACK, NUM_OUT).reshape(B, NUM_OUT)

# TODO(synk): training-mode BatchNorm (batch statistics), the spikingjelly
# time-shared Dropout mask and the ATan surrogate gradient (backward-only)
# are not implemented; inference-mode forward semantics are used.


def make_run(args=Args):
    jnp_like = _roll_is_jnp_like()                 # probe roll convention (host)
    sh1 = _shift_amounts(IMG, P1, jnp_like)
    sh2 = _shift_amounts(H2, P2, jnp_like)

    @jax.jit
    def run(params, x):
        return snasnet_forward(params, x, sh1, sh2, args)

    return run


if __name__ == "__main__":
    run = make_run()
    key = jax.random.PRNGKey(0)
    k_param, k_x = jax.random.split(key)
    params = init_params(k_param)
    x = jax.random.normal(k_x, (BATCH, IN_CH, IMG, IMG), jnp.float32)  # NCHW
    out = jax.block_until_ready(run(params, x))
    assert out.shape == (BATCH, NUM_OUT), out.shape
    assert bool(jnp.all(jnp.isfinite(out)))
    print("KERNEL_OK")
</pallas_src>

<mosaic_0001>
module attributes {stable_mosaic.version = 11 : i64} {
  func.func @k(%arg0: memref<8x128xf32, #tpu.memory_space<vmem>>, %arg1: memref<8x128xf32, #tpu.memory_space<vmem>>) attributes {dimension_semantics = [], scalar_prefetch = 0 : i64, scratch_operands = 0 : i64, tpu.core_type = #tpu.core_type<tc>} {
    %c0 = arith.constant 0 : index
    %c0_0 = arith.constant 0 : index
    %0 = vector.load %arg0[%c0, %c0_0] : memref<8x128xf32, #tpu.memory_space<vmem>>, vector<8x128xf32>
    %c1_i32 = arith.constant 1 : i32
    %1 = tpu.dynamic_rotate %0 by %c1_i32 dim 0 : vector<8x128xf32>, i32 -> vector<8x128xf32>
    %c0_1 = arith.constant 0 : index
    %c0_2 = arith.constant 0 : index
    %2 = vector.load %arg1[%c0_1, %c0_2] : memref<8x128xf32, #tpu.memory_space<vmem>>, vector<8x128xf32>
    tpu.vector_store %arg1[%c0_1, %c0_2], %1 {strides = array<i32>} : memref<8x128xf32, #tpu.memory_space<vmem>>, vector<8x128xf32>,
    return
  }
}

</mosaic_0001>

<bundles_post_ra>
// kernel: tpu_custom_call.1
= control target key start
LH: loop header
LB: loop body
LE: loop exit
PB: predicated region body
PF: predicated region fallthrough
CT: control target
= control target key end

     0   :  { %6 = vsyncpa [#allocation3], 0  ;;  %s125_s0 = inlined_call_operand.hbm [shape: f32[8,128], index: 0, kind: input, shape index: {}]   ;;  %s126_s1 = inlined_call_operand.hbm [shape: f32[8,128], index: 1, kind: output, shape index: {}]  }
   0x1   :  { %7 = vsyncpa [#allocation4], 0  ;;  %s89_s6 = smov [#allocation2]   ;;  %s41_s10 = scalar_lea.hbm %s125_s0, 128 }
   0x2   :  { %s14_s7 = sshll.u32 %s89_s6, 4  ;;  %p42_p0 = scmp.ne.s32.totalorder %s125_s0, %s41_s10  ;;  %s15_s7 = int_to_ptr.vmem [resolvable:$true] %s14_s7 }
   0x3   :  { %p45_p1 = scmp.lt.u32.totalorder %s41_s10, %s125_s0 }
   0x5   :  { %p47_p2 = pnand %p45_p1, %p42_p0 }
   0x7   :  { %50 = shalt.err (!%p47_p2)
}
   0x8   :  { %s51_s15 = scalar_lea.vmem %s15_s7, 128  ;;  %p56_p4 = scmp.lt.s32.totalorder %s15_s7, %s15_s7 }
   0x9   :  { %p52_p3 = scmp.ne.s32.totalorder %s15_s7, %s51_s15  ;;  %p57_p5 = scmp.lt.s32.totalorder %s51_s15, %s51_s15 }
   0xb   :  { %p58_p6 = por %p57_p5, %p56_p4 }
   0xd   :  { %p59_p7 = pnand %p58_p6, %p52_p3 }
   0xf   :  { %62 = shalt.err (!%p59_p7)
}
  0x10   :  { %17 = dma.hbm_to_vmem [thread:$0]  %s125_s0, 128, %s15_s7, [#allocation3]  }
  0x11   :  { %85 = dma.done.wait [#allocation3], 128  }
  0x12   :  { %86 = vsyncadd [#allocation3], 4294967168  ;;  %s90_s18 = smov [#allocation5]   ;;  %v21_v0 = vld [vmem:[#allocation2] sm:$0xff] }
  0x13   :  { %s30_s19 = sshll.u32 %s90_s18, 4  ;;  %v22_v1 = vrot.slane %v21_v0, 7  ;;  %s31_s19 = int_to_ptr.vmem [resolvable:$true] %s30_s19 }
  0x14   :  { %s63_s20 = scalar_lea.vmem %s31_s19, 128  ;;  %p68_p9 = scmp.lt.s32.totalorder %s31_s19, %s31_s19 }
  0x15   :  { %23 = vst [vmem:[#allocation5] sm:$0xff] %v22_v1  ;;  %p64_p8 = scmp.ne.s32.totalorder %s31_s19, %s63_s20  ;;  %p69_p10 = scmp.lt.s32.totalorder %s63_s20, %s63_s20 }
  0x17   :  { %p70_p11 = por %p69_p10, %p68_p9 }
  0x19   :  { %p71_p12 = pnand %p70_p11, %p64_p8 }
  0x1b   :  { %74 = shalt.err (!%p71_p12)
}
  0x1c   :  { %s75_s23 = scalar_lea.hbm %s126_s1, 128 }
  0x1d   :  { %p76_p13 = scmp.ne.s32.totalorder %s126_s1, %s75_s23  ;;  %p79_p0 = scmp.lt.u32.totalorder %s75_s23, %s126_s1 }
  0x1f   :  { %p81_p1 = pnand %p79_p0, %p76_p13 }
  0x21   :  { %84 = shalt.err (!%p81_p1)
}
  0x22   :  { %33 = dma.vmem_to_hbm [thread:$0]  %s31_s19, 128, %s126_s1, [#allocation4]  }
  0x23   :  { %87 = dma.done.wait [#allocation4], 128  }
  0x24   :  { %88 = vsyncadd [#allocation4], 4294967168 }
  0x25   :  { %37 = vsyncpa [#allocation3], 1 }
  0x26   :  { %38 = vsyncpa [#allocation4], 1 }

</bundles_post_ra>
